<compile_context>
chip_gen: v6e
topology: v6e:2x2x1
jax: 0.10.0
libtpu: 0.0.40
codegen_flags: <defaults>
</compile_context>

<pallas_src>
import functools

import jax
import jax.numpy as jnp
from jax import lax
from jax.experimental import pallas as pl
from jax.experimental.pallas import tpu as pltpu


def _round_up(x, m):
    return ((x + m - 1) // m) * m


def _predict_kernel(xh_ref, w1_ref, bias_ref, w2_ref, b2_ref, out_ref):
    # xh_ref  : (1, 1, TH+2, W+2, Cin)  zero-padded NHWC halo row-tile (bf16/f32)
    # w1_ref  : (9*Cin, C1)             3x3 conv weights, BN scale folded in
    # bias_ref: (1, C1)                 folded BatchNorm bias (f32)
    # w2_ref  : (C1, Ctp)               1x1 conv weights, lane-padded out chans
    # b2_ref  : (1, Ctp)                1x1 conv bias (f32, lane-padded)
    # out_ref : (1, TH, W, Ctp)
    TH = out_ref.shape[1]
    W = out_ref.shape[2]
    Cin = xh_ref.shape[4]

    xp = xh_ref[0, 0]  # (TH+2, W+2, Cin)

    # Only 3 dx-shifted slabs are materialized (sublane-offset slices); the dy
    # shifts below are leading-dim slices (cheap, no relayout).
    slabs = [xp[:, dx:dx + W, :] for dx in range(3)]  # each (TH+2, W, Cin)

    pieces = []
    for dy in range(3):
        for dx in range(3):
            pieces.append(slabs[dx][dy:dy + TH])      # (TH, W, Cin)
    patch = jnp.concatenate(pieces, axis=-1)          # (TH, W, 9*Cin)
    patch = patch.reshape(TH * W, 9 * Cin)            # layout-preserving (W % 8 == 0)

    # 3x3 conv + folded BN scale as one deep-K MXU matmul, f32 accumulate.
    y = jnp.dot(patch, w1_ref[...], preferred_element_type=jnp.float32)
    y = y + bias_ref[...]                             # folded BN bias (f32)
    y = jnp.where(y > 0, y, 0.01 * y)                 # LeakyReLU (PyTorch default)

    # 1x1 conv == channel matmul, lane-dense padded output channels.
    z = jnp.dot(y.astype(w2_ref.dtype), w2_ref[...],
                preferred_element_type=jnp.float32) + b2_ref[...]

    out_ref[0] = z.reshape(TH, W, -1).astype(out_ref.dtype)


def _choose_row_tile(H, W, Cin, C1, Ctp, budget_bytes=8 * 1024 * 1024):
    """Largest row tile whose (double-buffered) VMEM footprint fits the budget."""
    def footprint(th):
        in_tile = (th + 2) * (W + 2) * Cin * 2        # bf16 halo tile
        out_tile = th * W * Ctp * 4                   # f32 output tile
        patch = th * W * 9 * Cin * 2                  # bf16 im2col patch
        inter = th * W * C1 * 4                       # f32 intermediate y
        return 2 * (in_tile + out_tile) + patch + inter
    th = min(H, 128)
    while th > 8 and footprint(th) > budget_bytes:
        th //= 2
    return max(th, 1)


@functools.partial(jax.jit, static_argnames=("use_bf16", "row_tile"))
def predict_level_pallas(x_nchw, w1_hwio, bn_scale, bn_bias, w2_hwio, b2,
                         *, use_bf16=True, row_tile=None):
    """One element of PredictNet.predict_conv, NCHW in -> NCHW out."""
    N, Cin, H, W = x_nchw.shape
    C1 = w1_hwio.shape[-1]
    Ct = w2_hwio.shape[-1]
    Ctp = _round_up(Ct, 128)                          # lane-dense output channels
    cdt = jnp.bfloat16 if use_bf16 else jnp.float32

    # Fold BatchNorm scale into the 3x3 weights (one-time parameter transform).
    w1f = (w1_hwio * bn_scale.reshape(1, 1, 1, C1)).reshape(9 * Cin, C1).astype(cdt)
    bias = bn_bias.reshape(1, C1).astype(jnp.float32)
    w2p = jnp.zeros((C1, Ctp), jnp.float32).at[:, :Ct].set(
        w2_hwio.reshape(C1, Ct)).astype(cdt)
    b2p = jnp.zeros((1, Ctp), jnp.float32).at[:, :Ct].set(b2.reshape(1, Ct))

    TH = row_tile if row_tile is not None else _choose_row_tile(H, W, Cin, C1, Ctp)
    T = -(-H // TH)                                   # number of row tiles
    Hp = T * TH

    # NCHW -> NHWC, cast, zero-pad the conv halo (and H up to a tile multiple),
    # then build the halo-expanded row-tile array (N, T, TH+2, W+2, Cin).
    x = jnp.transpose(x_nchw, (0, 2, 3, 1)).astype(cdt)
    xpad = jnp.pad(x, ((0, 0), (1, 1 + (Hp - H)), (1, 1), (0, 0)))
    xh = jnp.stack([xpad[:, t * TH: t * TH + TH + 2] for t in range(T)], axis=1)

    out = pl.pallas_call(
        _predict_kernel,
        out_shape=jax.ShapeDtypeStruct((N, Hp, W, Ctp), jnp.float32),
        grid=(N, T),
        in_specs=[
            pl.BlockSpec((1, 1, TH + 2, W + 2, Cin), lambda n, t: (n, t, 0, 0, 0)),
            pl.BlockSpec((9 * Cin, C1), lambda n, t: (0, 0)),
            pl.BlockSpec((1, C1), lambda n, t: (0, 0)),
            pl.BlockSpec((C1, Ctp), lambda n, t: (0, 0)),
            pl.BlockSpec((1, Ctp), lambda n, t: (0, 0)),
        ],
        out_specs=pl.BlockSpec((1, TH, W, Ctp), lambda n, t: (n, t, 0, 0)),
        compiler_params=pltpu.CompilerParams(
            dimension_semantics=("parallel", "parallel"),
            vmem_limit_bytes=32 * 1024 * 1024,        # <= physical VMEM on all gens
        ),
    )(xh, w1f, bias, w2p, b2p)

    out = out[:, :H, :, :Ct]                          # drop row/channel padding
    return jnp.transpose(out, (0, 3, 1, 2))           # back to NCHW


def init_predict_net_params(key, feature_channels, target_channels):
    """Deterministic parameters matching PredictNet.__initialize_weights."""
    params = []
    for i, fc in enumerate(feature_channels):
        cin = fc // 2
        c1 = fc
        k1, k2 = jax.random.split(jax.random.fold_in(key, i))
        # Conv2d weights ~ N(0, 0.01); stored directly in HWIO layout.
        w1 = 0.01 * jax.random.normal(k1, (3, 3, cin, c1), jnp.float32)
        # BatchNorm2d: gamma=1, beta=0, running_mean=0, running_var=1, eps=1e-5.
        eps = 1e-5
        gamma = jnp.ones((c1,), jnp.float32)
        beta = jnp.zeros((c1,), jnp.float32)
        rmean = jnp.zeros((c1,), jnp.float32)
        rvar = jnp.ones((c1,), jnp.float32)
        bn_scale = gamma / jnp.sqrt(rvar + eps)
        bn_bias = beta - rmean * bn_scale
        # 1x1 Conv2d: weight ~ N(0, 0.01), bias zeroed.
        w2 = 0.01 * jax.random.normal(k2, (1, 1, c1, target_channels), jnp.float32)
        b2 = jnp.zeros((target_channels,), jnp.float32)
        params.append(dict(w1=w1, bn_scale=bn_scale, bn_bias=bn_bias, w2=w2, b2=b2))
    return params


def predict_net_pallas(features, params, row_tiles=None, use_bf16=True):
    if row_tiles is None:
        row_tiles = [None] * len(features)
    return [
        predict_level_pallas(x, p["w1"], p["bn_scale"], p["bn_bias"], p["w2"], p["b2"],
                             use_bf16=use_bf16, row_tile=rt)
        for x, p, rt in zip(features, params, row_tiles)
    ]


def _reference_level(x_nchw, w1_hwio, bn_scale, bn_bias, w2_hwio, b2, use_bf16=True):
    """Pure-JAX reference (lax conv) using the same folded/cast parameters."""
    cdt = jnp.bfloat16 if use_bf16 else jnp.float32
    C1 = w1_hwio.shape[-1]
    x = jnp.transpose(x_nchw, (0, 2, 3, 1)).astype(cdt)
    w1f = (w1_hwio * bn_scale.reshape(1, 1, 1, C1)).astype(cdt)
    dn = ("NHWC", "HWIO", "NHWC")
    y = lax.conv_general_dilated(x, w1f, (1, 1), "SAME", dimension_numbers=dn,
                                 preferred_element_type=jnp.float32)
    y = y + bn_bias
    y = jnp.where(y > 0, y, 0.01 * y)
    z = lax.conv_general_dilated(y.astype(cdt), w2_hwio.astype(cdt), (1, 1), "VALID",
                                 dimension_numbers=dn,
                                 preferred_element_type=jnp.float32)
    z = z + b2
    return jnp.transpose(z, (0, 3, 1, 2))


if __name__ == "__main__":
    key = jax.random.PRNGKey(0)

    # Small synthetic config: two feature levels.
    feature_channels = [8, 16]      # Conv input channels are fc // 2 -> 4, 8
    target_channels = 9
    batch = 2

    kx = jax.random.split(key, 1 + len(feature_channels))
    features = [
        jax.random.normal(kx[1], (batch, feature_channels[0] // 2, 16, 16), jnp.float32),
        jax.random.normal(kx[2], (batch, feature_channels[1] // 2, 8, 8), jnp.float32),
    ]
    params = init_predict_net_params(kx[0], feature_channels, target_channels)

    # bf16 MXU path; row_tile=8 on the 16x16 level exercises the multi-tile grid.
    row_tiles = [8, None]
    outs = predict_net_pallas(features, params, row_tiles=row_tiles, use_bf16=True)
    outs = [jax.block_until_ready(o) for o in outs]

    for x, p, o in zip(features, params, outs):
        ref = _reference_level(x, p["w1"], p["bn_scale"], p["bn_bias"], p["w2"], p["b2"],
                               use_bf16=True)
        assert o.shape == ref.shape, (o.shape, ref.shape)
        err = float(jnp.max(jnp.abs(o - ref)))
        assert jnp.allclose(o, ref, atol=1e-4, rtol=1e-2), err

    # Optional full-f32 path (bf16 cast disabled); looser tolerance since XLA's
    # default conv precision on TPU may itself truncate to bf16.
    outs32 = predict_net_pallas(features, params, row_tiles=row_tiles, use_bf16=False)
    outs32 = [jax.block_until_ready(o) for o in outs32]
    for x, p, o in zip(features, params, outs32):
        ref = _reference_level(x, p["w1"], p["bn_scale"], p["bn_bias"], p["w2"], p["b2"],
                               use_bf16=False)
        err = float(jnp.max(jnp.abs(o - ref)))
        assert jnp.allclose(o, ref, atol=5e-4, rtol=1e-2), err

    print("KERNEL_OK")
</pallas_src>

<mosaic_0001>
module attributes {stable_mosaic.version = 11 : i64} {
  func.func @_predict_kernel(%arg0: i32, %arg1: i32, %arg2: memref<1x1x10x18x4xbf16, #tpu.memory_space<vmem>>, %arg3: memref<36x8xbf16, #tpu.memory_space<vmem>>, %arg4: memref<1x8xf32, #tpu.memory_space<vmem>>, %arg5: memref<8x128xbf16, #tpu.memory_space<vmem>>, %arg6: memref<1x128xf32, #tpu.memory_space<vmem>>, %arg7: memref<1x8x16x128xf32, #tpu.memory_space<vmem>>) attributes {dimension_semantics = [#tpu.dimension_semantics<parallel>, #tpu.dimension_semantics<parallel>], iteration_bounds = array<i64: 2, 2>, scalar_prefetch = 0 : i64, scratch_operands = 0 : i64, tpu.core_type = #tpu.core_type<tc>, window_params = [{transform_indices = @transform_0, window_bounds = array<i64: 1, 1, 10, 18, 4>}, {pipeline_mode = #tpu.pipeline_mode<synchronous>, transform_indices = @transform_1, window_bounds = array<i64: 36, 8>}, {pipeline_mode = #tpu.pipeline_mode<synchronous>, transform_indices = @transform_2, window_bounds = array<i64: 1, 8>}, {pipeline_mode = #tpu.pipeline_mode<synchronous>, transform_indices = @transform_3, window_bounds = array<i64: 8, 128>}, {pipeline_mode = #tpu.pipeline_mode<synchronous>, transform_indices = @transform_4, window_bounds = array<i64: 1, 128>}, {transform_indices = @transform_5, window_bounds = array<i64: 1, 8, 16, 128>}]} {
    %c0 = arith.constant 0 : index
    %c0_0 = arith.constant 0 : index
    %c0_1 = arith.constant 0 : index
    %c0_2 = arith.constant 0 : index
    %c0_3 = arith.constant 0 : index
    %0 = vector.load %arg2[%c0, %c0_0, %c0_1, %c0_2, %c0_3] : memref<1x1x10x18x4xbf16, #tpu.memory_space<vmem>>, vector<1x1x10x18x4xbf16>
    %1 = vector.shape_cast %0 : vector<1x1x10x18x4xbf16> to vector<10x18x4xbf16>
    %2 = vector.extract_strided_slice %1 {offsets = [0, 0, 0], sizes = [10, 16, 4], strides = [1, 1, 1]} : vector<10x18x4xbf16> to vector<10x16x4xbf16>
    %3 = vector.extract_strided_slice %1 {offsets = [0, 1, 0], sizes = [10, 16, 4], strides = [1, 1, 1]} : vector<10x18x4xbf16> to vector<10x16x4xbf16>
    %4 = vector.extract_strided_slice %1 {offsets = [0, 2, 0], sizes = [10, 16, 4], strides = [1, 1, 1]} : vector<10x18x4xbf16> to vector<10x16x4xbf16>
    %5 = vector.extract_strided_slice %2 {offsets = [0, 0, 0], sizes = [8, 16, 4], strides = [1, 1, 1]} : vector<10x16x4xbf16> to vector<8x16x4xbf16>
    %6 = vector.extract_strided_slice %3 {offsets = [0, 0, 0], sizes = [8, 16, 4], strides = [1, 1, 1]} : vector<10x16x4xbf16> to vector<8x16x4xbf16>
    %7 = vector.extract_strided_slice %4 {offsets = [0, 0, 0], sizes = [8, 16, 4], strides = [1, 1, 1]} : vector<10x16x4xbf16> to vector<8x16x4xbf16>
    %8 = vector.extract_strided_slice %2 {offsets = [1, 0, 0], sizes = [8, 16, 4], strides = [1, 1, 1]} : vector<10x16x4xbf16> to vector<8x16x4xbf16>
    %9 = vector.extract_strided_slice %3 {offsets = [1, 0, 0], sizes = [8, 16, 4], strides = [1, 1, 1]} : vector<10x16x4xbf16> to vector<8x16x4xbf16>
    %10 = vector.extract_strided_slice %4 {offsets = [1, 0, 0], sizes = [8, 16, 4], strides = [1, 1, 1]} : vector<10x16x4xbf16> to vector<8x16x4xbf16>
    %11 = vector.extract_strided_slice %2 {offsets = [2, 0, 0], sizes = [8, 16, 4], strides = [1, 1, 1]} : vector<10x16x4xbf16> to vector<8x16x4xbf16>
    %12 = vector.extract_strided_slice %3 {offsets = [2, 0, 0], sizes = [8, 16, 4], strides = [1, 1, 1]} : vector<10x16x4xbf16> to vector<8x16x4xbf16>
    %13 = vector.extract_strided_slice %4 {offsets = [2, 0, 0], sizes = [8, 16, 4], strides = [1, 1, 1]} : vector<10x16x4xbf16> to vector<8x16x4xbf16>
    %14 = tpu.concatenate %5, %6, %7, %8, %9, %10, %11, %12, %13 in 2 : vector<8x16x4xbf16>, vector<8x16x4xbf16>, vector<8x16x4xbf16>, vector<8x16x4xbf16>, vector<8x16x4xbf16>, vector<8x16x4xbf16>, vector<8x16x4xbf16>, vector<8x16x4xbf16>, vector<8x16x4xbf16> -> vector<8x16x36xbf16>
    %15 = vector.shape_cast %14 : vector<8x16x36xbf16> to vector<128x36xbf16>
    %c0_4 = arith.constant 0 : index
    %c0_5 = arith.constant 0 : index
    %16 = vector.load %arg3[%c0_4, %c0_5] : memref<36x8xbf16, #tpu.memory_space<vmem>>, vector<36x8xbf16>
    %cst = arith.constant dense<0.000000e+00> : vector<128x8xf32>
    %17 = tpu.matmul %15, %16, %cst {dimension_numbers = #tpu.dot_dimension_numbers<[1], [0], [0], [1], [0, 0, 1, 1], [], []>} : vector<128x36xbf16>, vector<36x8xbf16>, vector<128x8xf32> -> vector<128x8xf32>
    %c0_6 = arith.constant 0 : index
    %c0_7 = arith.constant 0 : index
    %18 = vector.load %arg4[%c0_6, %c0_7] : memref<1x8xf32, #tpu.memory_space<vmem>>, vector<1x8xf32>
    %19 = vector.broadcast %18 : vector<1x8xf32> to vector<128x8xf32>
    %20 = arith.addf %17, %19 : vector<128x8xf32>
    %cst_8 = arith.constant 0.000000e+00 : f32
    %21 = vector.broadcast %cst_8 : f32 to vector<128x8xf32>
    %22 = arith.cmpf ogt, %20, %21 : vector<128x8xf32>
    %cst_9 = arith.constant 0.00999999977 : f32
    %23 = vector.broadcast %cst_9 : f32 to vector<128x8xf32>
    %24 = arith.mulf %23, %20 : vector<128x8xf32>
    %25 = arith.select %22, %20, %24 : vector<128x8xi1>, vector<128x8xf32>
    %26 = arith.truncf %25 : vector<128x8xf32> to vector<128x8xbf16>
    %c0_10 = arith.constant 0 : index
    %c0_11 = arith.constant 0 : index
    %27 = vector.load %arg5[%c0_10, %c0_11] : memref<8x128xbf16, #tpu.memory_space<vmem>>, vector<8x128xbf16>
    %cst_12 = arith.constant dense<0.000000e+00> : vector<128x128xf32>
    %28 = tpu.matmul %26, %27, %cst_12 {dimension_numbers = #tpu.dot_dimension_numbers<[1], [0], [0], [1], [0, 0, 1, 1], [], []>} : vector<128x8xbf16>, vector<8x128xbf16>, vector<128x128xf32> -> vector<128x128xf32>
    %c0_13 = arith.constant 0 : index
    %c0_14 = arith.constant 0 : index
    %29 = vector.load %arg6[%c0_13, %c0_14] : memref<1x128xf32, #tpu.memory_space<vmem>>, vector<1x128xf32>
    %30 = vector.broadcast %29 : vector<1x128xf32> to vector<128x128xf32>
    %31 = arith.addf %28, %30 : vector<128x128xf32>
    %32 = vector.shape_cast %31 : vector<128x128xf32> to vector<8x16x128xf32>
    %c0_15 = arith.constant 0 : index
    %c0_16 = arith.constant 0 : index
    %c0_17 = arith.constant 0 : index
    %c0_18 = arith.constant 0 : index
    %33 = vector.load %arg7[%c0_15, %c0_16, %c0_17, %c0_18] : memref<1x8x16x128xf32, #tpu.memory_space<vmem>>, vector<1x8x16x128xf32>
    %34 = vector.shape_cast %33 : vector<1x8x16x128xf32> to vector<8x16x128xf32>
    %35 = vector.shape_cast %32 : vector<8x16x128xf32> to vector<1x8x16x128xf32>
    tpu.vector_store %arg7[%c0_15, %c0_16, %c0_17, %c0_18], %35 {strides = array<i32>} : memref<1x8x16x128xf32, #tpu.memory_space<vmem>>, vector<1x8x16x128xf32>,
    return
  }
  func.func @transform_0(%arg0: i32, %arg1: i32) -> (i32, i32, i32, i32, i32) {
    %c0_i32 = arith.constant 0 : i32
    %c0_i32_0 = arith.constant 0 : i32
    %c0_i32_1 = arith.constant 0 : i32
    %c0_i32_2 = arith.constant 0 : i32
    return %arg0, %arg1, %c0_i32, %c0_i32_0, %c0_i32_1 : i32, i32, i32, i32, i32
  }
  func.func @transform_1(%arg0: i32, %arg1: i32) -> (i32, i32) {
    %c0_i32 = arith.constant 0 : i32
    %c0_i32_0 = arith.constant 0 : i32
    %c0_i32_1 = arith.constant 0 : i32
    return %c0_i32, %c0_i32_0 : i32, i32
  }
  func.func @transform_2(%arg0: i32, %arg1: i32) -> (i32, i32) {
    %c0_i32 = arith.constant 0 : i32
    %c0_i32_0 = arith.constant 0 : i32
    %c0_i32_1 = arith.constant 0 : i32
    return %c0_i32, %c0_i32_0 : i32, i32
  }
  func.func @transform_3(%arg0: i32, %arg1: i32) -> (i32, i32) {
    %c0_i32 = arith.constant 0 : i32
    %c0_i32_0 = arith.constant 0 : i32
    %c0_i32_1 = arith.constant 0 : i32
    return %c0_i32, %c0_i32_0 : i32, i32
  }
  func.func @transform_4(%arg0: i32, %arg1: i32) -> (i32, i32) {
    %c0_i32 = arith.constant 0 : i32
    %c0_i32_0 = arith.constant 0 : i32
    %c0_i32_1 = arith.constant 0 : i32
    return %c0_i32, %c0_i32_0 : i32, i32
  }
  func.func @transform_5(%arg0: i32, %arg1: i32) -> (i32, i32, i32, i32) {
    %c0_i32 = arith.constant 0 : i32
    %c0_i32_0 = arith.constant 0 : i32
    %c0_i32_1 = arith.constant 0 : i32
    return %arg0, %arg1, %c0_i32, %c0_i32_0 : i32, i32, i32, i32
  }
}

</mosaic_0001>

<bundles_post_ra>
// kernel: predict_level_pallas.1
= control target key start
LH: loop header
LB: loop body
LE: loop exit
PB: predicated region body
PF: predicated region fallthrough
CT: control target
= control target key end

     0   :  { %s1506_s18 = smov 0   ;;  %s1508_s19 = smov 0   ;;  %s1935_s0 = inlined_call_operand.vmem [shape: bf16[2,2,10,18,4], index: 0, kind: input, shape index: {}]   ;;  %s1936_s1 = inlined_call_operand.vmem [shape: bf16[36,8], index: 1, kind: input, shape index: {}]   ;;  %s1937_s2 = inlined_call_operand.vmem [shape: f32[1,8], index: 2, kind: input, shape index: {}]   ;;  %s1938_s3 = inlined_call_operand.vmem [shape: bf16[8,128], index: 3, kind: input, shape index: {}]   ;;  %s1939_s4 = inlined_call_operand.vmem [shape: f32[1,128], index: 4, kind: input, shape index: {}]   ;;  %s1940_s5 = inlined_call_operand.vmem [shape: f32[2,16,16,128], index: 5, kind: output, shape index: {}]  }
   0x1   :  { %s1510_s20 = smov 0   ;;  %s1512_s21 = smov 0  }
   0x2   :  { %s1514_s22 = smov 0  }
   0x3 LB: > { %s24_s23 = sadd.s32 1, %s1458_s20  ;;  %s27_s24 = sadd.s32 1, %s1462_s21  ;;  %s1466_s22 = sphi %s1514_s22, %s15_s22   ;;  %s1462_s21 = sphi %s1512_s21, %s1944_s21   ;;  %s1458_s20 = sphi %s1510_s20, %s1943_s20   ;;  %s1454_s19 = sphi %s1508_s19, %s1942_s19   ;;  %s1450_s18 = sphi %s1506_s18, %s1941_s18  }
   0x4   : > { %p25_p0 = scmp.ge.s32.totalorder %s24_s23, 2  ;;  %p1244_p1 = scmp.ge.s32.totalorder %s1466_s22, 1 }
   0x5   : > { %p207_p2 = scmp.lt.s32.totalorder %s1466_s22, 5 }
   0x6   : > { %s1946_s23 = smov (%p25_p0, %s24_s23), 0  ;;  %s1948_s24 = smov (!%p25_p0, %s27_s24), %s1462_s21 }
   0x7   : > { %p208_p3 = pnand %p1244_p1, %p207_p2  ;;  %p29_p4 = scmp.ge.s32.totalorder %s1948_s24, 2 }
   0x8   : > { %p244_p5 = scmp.lt.s32.totalorder (!%p208_p3), %s1454_s19, 1  ;;  %p246_p6 = scmp.lt.s32.totalorder (!%p208_p3), %s1450_s18, 1 }
   0x9   : > { %s1950_s24 = smov (%p29_p4, %s1948_s24), 0  ;;  %211 = sbr.rel (%p208_p3) target bundleno = 673 (0x2a1), region = 40 }
   0xa   : > { %s1468_s8 = smov (!%p208_p3), 12   ;;  %s1469_s9 = smov (!%p208_p3), 20  }
   0xb   : > { %s1470_s10 = smov (!%p208_p3), 8   ;;  %s1471_s11 = smov (!%p208_p3), 4  }
   0xc   : > { %s1472_s12 = smov (!%p208_p3), 16   ;;  %s1473_s13 = smov (!%p208_p3), 24  }
   0xd   : > { %s1474_s14 = smov (!%p208_p3), 28  }
   0xe   : > { %s1952_s19 = smov (!%p244_p5, %s1454_s19), 1  ;;  %vm472_vm0 = vcmask 1046528   ;;  %vm359_vm1 = vsmask.f32 7424  ;;  %vm835_vm2 = vcmask 1041408   ;;  %vm655_vm3 = vcmask 31744  }
   0xf   : > { %s247_s25 = scalar_select %p246_p6, %s1450_s18, 1  ;;  %vm672_vm4 = vcmask 64512   ;;  %vm689_vm5 = vcmask 97280   ;;  %vm706_vm6 = vcmask 130048   ;;  %vm723_vm7 = vcmask 162816  }
  0x10   : > { %s1356_s26 = smul.u32 60, %s1952_s19  ;;  %vm740_vm8 = vcmask 195584   ;;  %vm757_vm9 = vcmask 228352   ;;  %vm774_vm10 = vcmask 261120   ;;  %vm818_vm11 = vcmask 293888  }
  0x11   : > { %s1355_s27 = smul.u32 30, %s247_s25  ;;  %vm1024_vm12 = vcmask 1043456  }
  0x13   : > { %s250_s28 = sadd.s32 %s1356_s26, %s1355_s27  ;;  %s1475_s26 = smov 32  }
  0x14   : > { %s1245_s29 = sshll.u32 %s250_s28, 2 }
  0x15   : > { %s1546_s7 = scalar_lea.vmem %s1935_s0, %s1245_s29 }
  0x16   : > { %v1549_v0 = vld [vmem:[%s1546_s7 + $0x18] sm:$0xff]   ;;  %v1552_v1 = vld [vmem:[%s1546_s7 + $0xc] sm:$0xff]   ;;  %v1407_v2 = vld [vmem:[%s1546_s7 + $0x14] ss:$0 sps:$4 sm:$0x11]  }
  0x17   : > { %520 = vrot.lane.b32.xlu1 %v1549_v0, %s1468_s8  ;;  %v1558_v3 = vld [vmem:[%s1546_s7] sm:$0xff]   ;;  %518 = vrot.lane.b32.xlu0 %v1552_v1, %s1468_s8  ;;  %v476_v4 = vrot.slane %v1552_v1, 1  ;;  %v477_v5 = vrot.slane %v1407_v2, 1  ;;  %v1409_v6 = vld [vmem:[%s1546_s7 + $0x8] ss:$0 sps:$4 sm:$0x11]  }
  0x18   : > { %v473_v7 = vrot.slane %v1558_v3, 1  ;;  %v361_v8 = vshrl.u32 %v1558_v3, 16  ;;  %v363_v9 = vshll.u32 %v1558_v3, 16  ;;  %v373_v10 = vshrl.u32 %v1552_v1, 16  ;;  %v1575_v22 = vld [vmem:[%s1546_s7 + $0x24] sm:$0xff]   ;;  %v1609_v52 = vld [vmem:[%s1546_s7 + $0x54] sm:$0xff]  }
  0x19   : > { %v478_v11 = vsel %vm472_vm0, %v476_v4, %v477_v5  ;;  %v474_v12 = vrot.slane %v1409_v6, 1  ;;  %v368_v13 = vshll.u32 %v1409_v6, 16  ;;  %v1410_v14 = vld [vmem:[%s1546_s7 + $0x20] ss:$0 sps:$4 sm:$0x11]   ;;  %v375_v15 = vshll.u32 %v1552_v1, 16 }
  0x1a   : > { %v365_v16 = vrot.slane %v363_v9, 1  ;;  %v380_v17 = vshll.u32 %v1407_v2, 16  ;;  %v387_v18 = vshll.u32 %v1549_v0, 16  ;;  %v479_v24 = vrot.slane %v1549_v0, 1  ;;  %v1592_v38 = vld [vmem:[%s1546_s7 + $0x48] sm:$0xff]   ;;  %v1620_v59 = vld [vmem:[%s1546_s7 + $0x60] sm:$0xff]  }
  0x1b   : > { %568 = vrot.lane.b32.xlu0 %v478_v11, %s1469_s9  ;;  %v475_v19 = vsel %vm472_vm0, %v473_v7, %v474_v12  ;;  %v370_v20 = vrot.slane %v368_v13, 1  ;;  %v377_v21 = vrot.slane %v375_v15, 1  ;;  %v385_v26 = vshrl.u32 %v1549_v0, 16  ;;  %v1583_v32 = vld [vmem:[%s1546_s7 + $0x2c] ss:$0 sps:$4 sm:$0x11]  }
  0x1c   : > { %497 = vrot.lane.b32.xlu1 %v475_v19, %s1470_s10  ;;  %v366_v23 = vor.u32 %v365_v16, %v361_v8  ;;  %v382_v25 = vrot.slane %v380_v17, 1  ;;  %v480_v27 = vrot.slane %v1410_v14, 1  ;;  %v389_v29 = vrot.slane %v387_v18, 1  ;;  %v1418_v44 = vld [vmem:[%s1546_s7 + $0x50] ss:$0 sps:$4 sm:$0x11]  }
  0x1d   : > { %v378_v28 = vor.u32 %v377_v21, %v373_v10  ;;  %v392_v30 = vshll.u32 %v1410_v14, 16  ;;  %v399_v33 = vshll.u32 %v1575_v22, 16  ;;  %v397_v39 = vshrl.u32 %v1575_v22, 16  ;;  %v1420_v54 = vld [vmem:[%s1546_s7 + $0x5c] ss:$0 sps:$4 sm:$0x11]  }
  0x1e   : > { %v371_v31 = vsel %vm359_vm1, %v366_v23, %v370_v20  ;;  %v1589_v35 = vsel %vm472_vm0, %v479_v24, %v480_v27  ;;  %v390_v36 = vor.u32 %v389_v29, %v385_v26  ;;  %v404_v41 = vshll.u32 %v1583_v32, 16  ;;  %v1625_v2 = vld [vmem:[%s1546_s7 + $0x6c] sm:$0xff]   ;;  %v1422_v6 = vld [vmem:[%s1546_s7 + $0x68] ss:$0 sps:$4 sm:$0x11]  }
  0x1f   : > { %456 = vrot.lane.b32.xlu0 %v371_v31, %s1471_s11  ;;  %v383_v34 = vsel %vm359_vm1, %v378_v28, %v382_v25  ;;  %v394_v37 = vrot.slane %v392_v30, 1  ;;  %v401_v40 = vrot.slane %v399_v33, 1  ;;  %v482_v43 = vrot.slane %v1575_v22, 1  ;;  %v1424_v18 = vld [vmem:[%s1546_s7 + $0x74] ss:$0 sps:$4 sm:$0x11]  }
  0x20   : > { %499 = vrot.lane.b32.xlu1 %v478_v11, %s1470_s10  ;;  %v433_v45 = vshrl.u32 %v1592_v38, 16  ;;  %v435_v46 = vshll.u32 %v1592_v38, 16  ;;  %v491_v47 = vrot.slane %v1592_v38, 1  ;;  %v406_v49 = vrot.slane %v404_v41, 1  ;;  %v1662_v30 = vld [vmem:[%s1546_s7 + $0x30] sm:$0xff]   ;;  %v1426_v33 = vld [vmem:[%s1936_s1 + $0x8] sm:$0xff]  }
  0x21   : > { %v1600_v42 = vsel %vm359_vm1, %v390_v36, %v394_v37  ;;  %v402_v48 = vor.u32 %v401_v40, %v397_v39  ;;  %v440_v50 = vshll.u32 %v1418_v44, 16  ;;  %v492_v51 = vrot.slane %v1418_v44, 1  ;;  %v1425_v25 = vld [vmem:[%s1936_s1 + $0x10] ss:$0 sps:$4 sm:$0x33]  }
  0x22   : > { %v437_v53 = vrot.slane %v435_v46, 1  ;;  %v483_v55 = vrot.slane %v1583_v32, 1  ;;  %v445_v58 = vshrl.u32 %v1609_v52, 16  ;;  %v447_v61 = vshll.u32 %v1609_v52, 16  ;;  %1353 = vmatprep.subr.msk.bf16.mxu0 %vm835_vm2, %v1425_v25  ;;  %v1427_v46 = vld [vmem:[%s1936_s1] sm:$0xff]  }
  0x23   : > { %458 = vrot.lane.b32.xlu0 %v383_v34, %s1471_s11  ;;  %v442_v56 = vrot.slane %v440_v50, 1  ;;  %v1616_v57 = vsel %vm472_vm0, %v491_v47, %v492_v51  ;;  %v452_v62 = vshll.u32 %v1420_v54, 16  ;;  %v494_v63 = vrot.slane %v1609_v52, 1  ;;  %v1414_v41 = vld [vmem:[%s1546_s7 + $0x38] ss:$0 sps:$4 sm:$0x11]  }
  0x24   : > { %570 = vrot.lane.b32.xlu1 %v1589_v35, %s1469_s9  ;;  %v438_v60 = vor.u32 %v437_v53, %v433_v45  ;;  %v1630_v4 = vsel %vm359_vm1, %v402_v48, %v406_v49  ;;  %v495_v5 = vrot.slane %v1420_v54, 1  ;;  %v538_v7 = vshrl.u32 %v1620_v59, 16  ;;  %v1696_v50 = vld [vmem:[%s1546_s7 + $0x3c] sm:$0xff]  }
  0x25   : > { %v540_v8 = vshll.u32 %v1620_v59, 16  ;;  %v449_v10 = vrot.slane %v447_v61, 1  ;;  %v454_v11 = vrot.slane %v452_v62, 1  ;;  %v565_v12 = vrot.slane %v1620_v59, 1 }
  0x26   : > { %v1638_v9 = vsel %vm359_vm1, %v438_v60, %v442_v56  ;;  %v1642_v13 = vsel %vm472_vm0, %v494_v63, %v495_v5  ;;  %v545_v15 = vshll.u32 %v1422_v6, 16  ;;  %v566_v16 = vrot.slane %v1422_v6, 1 }
  0x27   : > { %549 = vrot.lane.b32.xlu0 %v383_v34, %s1472_s12  ;;  %v542_v14 = vrot.slane %v540_v8, 1  ;;  %v450_v17 = vor.u32 %v449_v10, %v445_v58  ;;  %v609_v19 = vshrl.u32 %v1625_v2, 16  ;;  %v611_v24 = vshll.u32 %v1625_v2, 16 }
  0x28   : > { %551 = vrot.lane.b32.xlu1 %v1600_v42, %s1472_s12  ;;  %v547_v21 = vrot.slane %v545_v15, 1  ;;  %v1649_v23 = vsel %vm472_vm0, %v565_v12, %v566_v16  ;;  %v616_v27 = vshll.u32 %v1424_v18, 16  ;;  %v636_v28 = vrot.slane %v1625_v2, 1 }
  0x29   : > { %v543_v20 = vor.u32 %v542_v14, %v538_v7  ;;  %v1658_v26 = vsel %vm359_vm1, %v450_v17, %v454_v11  ;;  %v637_v29 = vrot.slane %v1424_v18, 1  ;;  %v613_v32 = vrot.slane %v611_v24, 1 }
  0x2a   : > { %v618_v34 = vrot.slane %v616_v27, 1  ;;  %v837_v39 = vsel %vm835_vm2, %v1425_v25, 0  ;;  %v484_v40 = vsel %vm472_vm0, %v482_v43, %v483_v55  ;;  %v411_v44 = vshll.u32 %v1662_v30, 16  ;;  %v1416_v55 = vld [vmem:[%s1546_s7 + $0x44] ss:$0 sps:$4 sm:$0x11]  }
  0x2b   : > { %589 = vrot.lane.b32.xlu0 %v1549_v0, %s1473_s13  ;;  %v1665_v31 = vsel %vm359_vm1, %v543_v20, %v547_v21  ;;  %v1671_v36 = vsel %vm472_vm0, %v636_v28, %v637_v29  ;;  %v614_v37 = vor.u32 %v613_v32, %v609_v19  ;;  %1314 = vmatpush3.bf16.msra.mxu0 %v837_v39  ;;  %v416_v47 = vshll.u32 %v1414_v41, 16 }
  0x2c   : > { %591 = vrot.lane.b32.xlu1 %v1575_v22, %s1473_s13  ;;  %1315 = vmatprep.subr.bf16.mxu0 %v1426_v33  ;;  %v413_v43 = vrot.slane %v411_v44, 1  ;;  %v485_v53 = vrot.slane %v1662_v30, 1  ;;  %v486_v54 = vrot.slane %v1414_v41, 1  ;;  %v421_v58 = vshrl.u32 %v1696_v50, 16 }
  0x2d   : > { %v1683_v45 = vsel %vm359_vm1, %v614_v37, %v618_v34  ;;  %v418_v49 = vrot.slane %v416_v47, 1  ;;  %v428_v61 = vshll.u32 %v1416_v55, 16  ;;  %v488_v5 = vrot.slane %v1696_v50, 1 }
  0x2e   : > { %v487_v56 = vsel %vm472_vm0, %v485_v53, %v486_v54  ;;  %v489_v6 = vrot.slane %v1416_v55, 1 }
  0x2f   : > { %620 = vrot.lane.b32.xlu0 %v1600_v42, %s1474_s14  ;;  %1316 = vmatpush3.bf16.msra.mxu0 %v1426_v33  ;;  %v430_v63 = vrot.slane %v428_v61, 1 }
  0x30   : > { %622 = vrot.lane.b32.xlu1 %v1630_v4, %s1474_s14  ;;  %1317 = vmatprep.subr.bf16.mxu0 %v1427_v46  ;;  %v490_v7 = vsel %vm472_vm0, %v488_v5, %v489_v6 }
  0x33   : > { %639 = vrot.lane.b32.xlu0 %v1589_v35, %s1475_s26  ;;  %1318 = vmatpush3.bf16.msra.mxu0 %v1427_v46 }
  0x34   : > { %460 = vrot.lane.b32.xlu1 %v1600_v42, %s1471_s11  ;;  %v409_v42 = vshrl.u32 %v1662_v30, 16 }
  0x36   : > { %v414_v48 = vor.u32 %v413_v43, %v409_v42 }
  0x37   : > { %641 = vrot.lane.b32.xlu0 %v484_v40, %s1475_s26 }
  0x38   : > { %462 = vrot.lane.b32.xlu1 %v1630_v4, %s1471_s11  ;;  %v419_v51 = vsel %vm359_vm1, %v414_v48, %v418_v49 }
  0x3b   : > { %501 = vrot.lane.b32.xlu0 %v1589_v35, %s1470_s10  ;;  %v423_v35 = vshll.u32 %v1696_v50, 16 }
  0x3c   : > { %503 = vrot.lane.b32.xlu1 %v484_v40, %s1470_s10 }
  0x3d   : > { %v425_v60 = vrot.slane %v423_v35, 1 }
  0x3f   : > { %522 = vrot.lane.b32.xlu0 %v1575_v22, %s1468_s8  ;;  %v426_v62 = vor.u32 %v425_v60, %v421_v58 }
  0x40   : > { %524 = vrot.lane.b32.xlu1 %v1662_v30, %s1468_s8 }
  0x43   : > { %553 = vrot.lane.b32.xlu0 %v1630_v4, %s1472_s12  ;;  %v431_v4 = vsel %vm359_vm1, %v426_v62, %v430_v63 }
  0x44   : > { %555 = vrot.lane.b32.xlu1 %v419_v51, %s1472_s12 }
  0x47   : > { %572 = vrot.lane.b32.xlu0 %v484_v40, %s1469_s9 }
  0x48   : > { %574 = vrot.lane.b32.xlu1 %v487_v56, %s1469_s9 }
  0x4b   : > { %593 = vrot.lane.b32.xlu0 %v1662_v30, %s1473_s13 }
  0x4c   : > { %595 = vrot.lane.b32.xlu1 %v1696_v50, %s1473_s13 }
  0x4f   : > { %624 = vrot.lane.b32.xlu0 %v419_v51, %s1474_s14 }
  0x50   : > { %626 = vrot.lane.b32.xlu1 %v431_v4, %s1474_s14 }
  0x53   : > { %643 = vrot.lane.b32.xlu0 %v487_v56, %s1475_s26 }
  0x54   : > { %464 = vrot.lane.b32.xlu1 %v419_v51, %s1471_s11 }
  0x57   : > { %645 = vrot.lane.b32.xlu0 %v490_v7, %s1475_s26 }
  0x58   : > { %466 = vrot.lane.b32.xlu1 %v431_v4, %s1471_s11 }
  0x5b   : > { %505 = vrot.lane.b32.xlu0 %v487_v56, %s1470_s10 }
  0x5c   : > { %507 = vrot.lane.b32.xlu1 %v490_v7, %s1470_s10 }
  0x5f   : > { %526 = vrot.lane.b32.xlu0 %v1696_v50, %s1468_s8 }
  0x60   : > { %528 = vrot.lane.b32.xlu1 %v1592_v38, %s1468_s8 }
  0x63   : > { %557 = vrot.lane.b32.xlu0 %v431_v4, %s1472_s12 }
  0x64   : > { %559 = vrot.lane.b32.xlu1 %v1638_v9, %s1472_s12 }
  0x67   : > { %576 = vrot.lane.b32.xlu0 %v490_v7, %s1469_s9 }
  0x68   : > { %578 = vrot.lane.b32.xlu1 %v1616_v57, %s1469_s9 }
  0x6b   : > { %597 = vrot.lane.b32.xlu0 %v1592_v38, %s1473_s13 }
  0x6c   : > { %599 = vrot.lane.b32.xlu1 %v1609_v52, %s1473_s13 }
  0x6f   : > { %628 = vrot.lane.b32.xlu0 %v1638_v9, %s1474_s14 }
  0x70   : > { %630 = vrot.lane.b32.xlu1 %v1658_v26, %s1474_s14 }
  0x73   : > { %647 = vrot.lane.b32.xlu0 %v1616_v57, %s1475_s26 }
  0x74   : > { %468 = vrot.lane.b32.xlu1 %v1638_v9, %s1471_s11 }
  0x77   : > { %649 = vrot.lane.b32.xlu0 %v1642_v13, %s1475_s26 }
  0x78   : > { %470 = vrot.lane.b32.xlu1 %v1658_v26, %s1471_s11 }
  0x7b   : > { %509 = vrot.lane.b32.xlu0 %v1616_v57, %s1470_s10 }
  0x7c   : > { %511 = vrot.lane.b32.xlu1 %v1642_v13, %s1470_s10  ;;  %s1248_s10 = sshll.u32 %s1952_s19, 5 }
  0x7f   : > { %530 = vrot.lane.b32.xlu0 %v1609_v52, %s1468_s8 }
  0x80   : > { %532 = vrot.lane.b32.xlu1 %v1620_v59, %s1468_s8  ;;  %s1246_s8 = sshll.u32 %s1450_s18, 3 }
  0x81   : > { %p256_p7 = scmp.lt.s32.totalorder %s1246_s8, 15 }
  0x83   : > { %561 = vrot.lane.b32.xlu0 %v1658_v26, %s1472_s12  ;;  %s1954_s8 = smov (!%p256_p7, %s1246_s8), 15 }
  0x84   : > { %563 = vrot.lane.b32.xlu1 %v1665_v31, %s1472_s12 }
  0x87   : > { %580 = vrot.lane.b32.xlu0 %v1642_v13, %s1469_s9 }
  0x88   : > { %582 = vrot.lane.b32.xlu1 %v1649_v23, %s1469_s9  ;;  %s1247_s9 = sshll.u32 %s1954_s8, 1 }
  0x89   : > { %v521_v57 = vpop.permute.xlu1 %520  ;;  %v519_v8 = vpop.permute.xlu0 %518  ;;  %s260_s11 = sadd.s32 %s1248_s10, %s1247_s9 }
  0x8a   : > { %s1249_s12 = sshll.u32 %s260_s11, 3 }
  0x8b   : > { %601 = vrot.lane.b32.xlu0 %v1620_v59, %s1473_s13  ;;  %s1902_s17 = scalar_lea.vmem %s1940_s5, %s1249_s12 }
  0x8c   : > { %603 = vrot.lane.b32.xlu1 %v1625_v2, %s1473_s13 }
  0x8d   : > { %v569_v9 = vpop.permute.xlu0 %568 }
  0x8e   : > { %v498_v10 = vpop.permute.xlu1 %497 }
  0x8f   : > { %632 = vrot.lane.b32.xlu0 %v1665_v31, %s1474_s14 }
  0x90   : > { %634 = vrot.lane.b32.xlu1 %v1683_v45, %s1474_s14 }
  0x91   : > { %v457_v11 = vpop.permute.xlu0 %456 }
  0x92   : > { %v500_v12 = vpop.permute.xlu1 %499  ;;  %v657_v2 = vsel %vm655_vm3, %v1558_v3, %v457_v11 }
  0x93   : > { %651 = vrot.lane.b32.xlu0 %v1649_v23, %s1475_s26  ;;  %v674_v17 = vsel %vm672_vm4, %v657_v2, %v498_v10 }
  0x94   : > { %653 = vrot.lane.b32.xlu1 %v1671_v36, %s1475_s26  ;;  %v691_v21 = vsel %vm689_vm5, %v674_v17, %v519_v8 }
  0x95   : > { %v459_v59 = vpop.permute.xlu0 %458 }
  0x96   : > { %v571_v13 = vpop.permute.xlu1 %570  ;;  %v659_v16 = vsel %vm655_vm3, %v1552_v1, %v459_v59 }
  0x97   : > { %v676_v19 = vsel %vm672_vm4, %v659_v16, %v500_v12 }
  0x98   : > { %v693_v3 = vsel %vm689_vm5, %v676_v19, %v521_v57 }
  0x99   : > { %v550_v14 = vpop.permute.xlu0 %549 }
  0x9a   : > { %v552_v15 = vpop.permute.xlu1 %551  ;;  %v708_v23 = vsel %vm706_vm6, %v691_v21, %v550_v14 }
  0x9b   : > { %v725_v1 = vsel %vm723_vm7, %v708_v23, %v569_v9  ;;  %v710_v26 = vsel %vm706_vm6, %v693_v3, %v552_v15 }
  0x9c   : > { %v727_v33 = vsel %vm723_vm7, %v710_v26, %v571_v13 }
  0x9d   : > { %v590_v18 = vpop.permute.xlu0 %589 }
  0x9e   : > { %v592_v20 = vpop.permute.xlu1 %591  ;;  %v742_v27 = vsel %vm740_vm8, %v725_v1, %v590_v18 }
  0x9f   : > { %v744_v34 = vsel %vm740_vm8, %v727_v33, %v592_v20 }
  0xa1   : > { %v621_v24 = vpop.permute.xlu0 %620 }
  0xa2   : > { %v623_v25 = vpop.permute.xlu1 %622  ;;  %v759_v28 = vsel %vm757_vm9, %v742_v27, %v621_v24 }
  0xa3   : > { %v761_v36 = vsel %vm757_vm9, %v744_v34, %v623_v25 }
  0xa5   : > { %v640_v29 = vpop.permute.xlu0 %639 }
  0xa6   : > { %v461_v31 = vpop.permute.xlu1 %460  ;;  %v776_v32 = vsel %vm774_vm10, %v759_v28, %v640_v29 }
  0xa7   : > { %1319 = vmatprep.mubr.msk.bf16.mxu0 %vm818_vm11, %v776_v32  ;;  %v661_v53 = vsel %vm655_vm3, %v1549_v0, %v461_v31 }
  0xa9   : > { %v642_v37 = vpop.permute.xlu0 %641 }
  0xaa   : > { %v463_v39 = vpop.permute.xlu1 %462  ;;  %v778_v40 = vsel %vm774_vm10, %v761_v36, %v642_v37 }
  0xab   : > { %1320 = vmatmul.mubr.msk.bf16.vlgmr.msra.gmra.mxu0 %vm818_vm11, %v778_v40  ;;  %v663_v60 = vsel %vm655_vm3, %v1575_v22, %v463_v39 }
  0xad   : > { %v502_v41 = vpop.permute.xlu0 %501 }
  0xae   : > { %v504_v44 = vpop.permute.xlu1 %503  ;;  %v678_v54 = vsel %vm672_vm4, %v661_v53, %v502_v41 }
  0xaf   : > { %v680_v62 = vsel %vm672_vm4, %v663_v60, %v504_v44 }
  0xb1   : > { %v523_v45 = vpop.permute.xlu0 %522 }
  0xb2   : > { %v525_v46 = vpop.permute.xlu1 %524  ;;  %v695_v55 = vsel %vm689_vm5, %v678_v54, %v523_v45 }
  0xb3   : > { %v697_v4 = vsel %vm689_vm5, %v680_v62, %v525_v46 }
  0xb5   : > { %v554_v42 = vpop.permute.xlu0 %553 }
  0xb6   : > { %v556_v43 = vpop.permute.xlu1 %555  ;;  %v712_v56 = vsel %vm706_vm6, %v695_v55, %v554_v42 }
  0xb7   : > { %v714_v6 = vsel %vm706_vm6, %v697_v4, %v556_v43 }
  0xb9   : > { %v573_v47 = vpop.permute.xlu0 %572 }
  0xba   : > { %v575_v48 = vpop.permute.xlu1 %574  ;;  %v729_v61 = vsel %vm723_vm7, %v712_v56, %v573_v47 }
  0xbb   : > { %v731_v8 = vsel %vm723_vm7, %v714_v6, %v575_v48  ;;  %v992_v48 = vld [vmem:[%s1938_s3] sm:$0xf] }
  0xbc   : > { %1354 = vmatprep.subr.msk.bf16.mxu1 %vm1024_vm12, %v992_v48 }
  0xbd   : > { %v594_v49 = vpop.permute.xlu0 %593 }
  0xbe   : > { %v596_v51 = vpop.permute.xlu1 %595  ;;  %v746_v63 = vsel %vm740_vm8, %v729_v61, %v594_v49 }
  0xbf   : > { %v748_v22 = vsel %vm740_vm8, %v731_v8, %v596_v51  ;;  %v1026_v51 = vsel %vm1024_vm12, %v992_v48, 0 }
  0xc0   : > { %1336 = vmatpush3.bf16.msra.mxu1 %v1026_v51 }
  0xc1   : > { %v625_v35 = vpop.permute.xlu0 %624 }
  0xc2   : > { %v627_v58 = vpop.permute.xlu1 %626  ;;  %v763_v0 = vsel %vm757_vm9, %v746_v63, %v625_v35 }
  0xc3   : > { %v765_v9 = vsel %vm757_vm9, %v748_v22, %v627_v58 }
  0xc5   : > { %v644_v5 = vpop.permute.xlu0 %643 }
  0xc6   : > { %v465_v7 = vpop.permute.xlu1 %464  ;;  %v780_v57 = vsel %vm774_vm10, %v763_v0, %v644_v5 }
  0xc7   : > { %1323 = vmatprep.mubr.msk.bf16.mxu0 %vm818_vm11, %v780_v57  ;;  %v665_v21 = vsel %vm655_vm3, %v1662_v30, %v465_v7 }
  0xc9   : > { %v646_v10 = vpop.permute.xlu0 %645 }
  0xca   : > { %v467_v11 = vpop.permute.xlu1 %466  ;;  %v782_v12 = vsel %vm774_vm10, %v765_v9, %v646_v10 }
  0xcb   : > { %1324 = vmatmul.mubr.msk.bf16.gmra.mxu0 %vm818_vm11, %v782_v12  ;;  %v667_v26 = vsel %vm655_vm3, %v1696_v50, %v467_v11 }
  0xcd   : > { %v506_v59 = vpop.permute.xlu0 %505 }
  0xce   : > { %v508_v13 = vpop.permute.xlu1 %507  ;;  %v682_v23 = vsel %vm672_vm4, %v665_v21, %v506_v59 }
  0xcf   : > { %v684_v28 = vsel %vm672_vm4, %v667_v26, %v508_v13  ;;  %v1868_v13 = vld [vmem:[%s1937_s2] ss:$0 sm:$0xff] }
  0xd1   : > { %v527_v2 = vpop.permute.xlu0 %526 }
  0xd2   : > { %v529_v14 = vpop.permute.xlu1 %528  ;;  %v699_v3 = vsel %vm689_vm5, %v682_v23, %v527_v2 }
  0xd3   : > { %v701_v31 = vsel %vm689_vm5, %v684_v28, %v529_v14 }
  0xd5   : > { %v558_v15 = vpop.permute.xlu0 %557 }
  0xd6   : > { %v560_v16 = vpop.permute.xlu1 %559  ;;  %v716_v25 = vsel %vm706_vm6, %v699_v3, %v558_v15 }
  0xd7   : > { %v718_v33 = vsel %vm706_vm6, %v701_v31, %v560_v16 }
  0xd9   : > { %v577_v17 = vpop.permute.xlu0 %576 }
  0xda   : > { %v579_v18 = vpop.permute.xlu1 %578  ;;  %v733_v27 = vsel %vm723_vm7, %v716_v25, %v577_v17 }
  0xdb   : > { %v735_v37 = vsel %vm723_vm7, %v718_v33, %v579_v18 }
  0xdd   : > { %v598_v19 = vpop.permute.xlu0 %597 }
  0xde   : > { %v600_v20 = vpop.permute.xlu1 %599  ;;  %v750_v29 = vsel %vm740_vm8, %v733_v27, %v598_v19 }
  0xdf   : > { %v752_v50 = vsel %vm740_vm8, %v735_v37, %v600_v20 }
  0xe1   : > { %v629_v24 = vpop.permute.xlu0 %628 }
  0xe2   : > { %v631_v1 = vpop.permute.xlu1 %630  ;;  %v767_v30 = vsel %vm757_vm9, %v750_v29, %v629_v24 }
  0xe3   : > { %v769_v39 = vsel %vm757_vm9, %v752_v50, %v631_v1 }
  0xe5   : > { %v648_v32 = vpop.permute.xlu0 %647 }
  0xe6   : > { %v469_v34 = vpop.permute.xlu1 %468  ;;  %v784_v36 = vsel %vm774_vm10, %v767_v30, %v648_v32 }
  0xe7   : > { %1327 = vmatprep.mubr.msk.bf16.mxu0 %vm818_vm11, %v784_v36  ;;  %v669_v56 = vsel %vm655_vm3, %v1592_v38, %v469_v34 }
  0xe9   : > { %v650_v40 = vpop.permute.xlu0 %649 }
  0xea   : > { %v471_v41 = vpop.permute.xlu1 %470  ;;  %v786_v44 = vsel %vm774_vm10, %v769_v39, %v650_v40 }
  0xeb   : > { %1328 = vmatmul.mubr.msk.bf16.gmra.mxu0 %vm818_vm11, %v786_v44  ;;  %v671_v58 = vsel %vm655_vm3, %v1609_v52, %v471_v41 }
  0xed   : > { %v510_v45 = vpop.permute.xlu0 %509 }
  0xee   : > { %v512_v46 = vpop.permute.xlu1 %511  ;;  %v686_v60 = vsel %vm672_vm4, %v669_v56, %v510_v45 }
  0xef   : > { %v688_v61 = vsel %vm672_vm4, %v671_v58, %v512_v46 }
  0xf1   : > { %v531_v42 = vpop.permute.xlu0 %530 }
  0xf2   : > { %v533_v43 = vpop.permute.xlu1 %532  ;;  %v703_v62 = vsel %vm689_vm5, %v686_v60, %v531_v42 }
  0xf3   : > { %v705_v4 = vsel %vm689_vm5, %v688_v61, %v533_v43 }
  0xf5   : > { %v562_v47 = vpop.permute.xlu0 %561 }
  0xf6   : > { %v564_v49 = vpop.permute.xlu1 %563  ;;  %v720_v0 = vsel %vm706_vm6, %v703_v62, %v562_v47 }
  0xf7   : > { %v722_v6 = vsel %vm706_vm6, %v705_v4, %v564_v49 }
  0xf9   : > { %v581_v53 = vpop.permute.xlu0 %580 }
  0xfa   : > { %v583_v54 = vpop.permute.xlu1 %582  ;;  %v737_v7 = vsel %vm723_vm7, %v720_v0, %v581_v53 }
  0xfb   : > { %v739_v38 = vsel %vm723_vm7, %v722_v6, %v583_v54 }
  0xfd   : > { %v602_v55 = vpop.permute.xlu0 %601 }
  0xfe   : > { %v604_v35 = vpop.permute.xlu1 %603  ;;  %v754_v52 = vsel %vm740_vm8, %v737_v7, %v602_v55 }
  0xff   : > { %v756_v57 = vsel %vm740_vm8, %v739_v38, %v604_v35 }
 0x101   : > { %v633_v63 = vpop.permute.xlu0 %632 }
 0x102   : > { %v635_v5 = vpop.permute.xlu1 %634  ;;  %v771_v8 = vsel %vm757_vm9, %v754_v52, %v633_v63 }
 0x103   : > { %v773_v9 = vsel %vm757_vm9, %v756_v57, %v635_v5 }
 0x105   : > { %v652_v22 = vpop.permute.xlu0 %651 }
 0x106   : > { %v654_v10 = vpop.permute.xlu1 %653  ;;  %v788_v11 = vsel %vm774_vm10, %v771_v8, %v652_v22 }
 0x107   : > { %v790_v12 = vsel %vm774_vm10, %v773_v9, %v654_v10  ;;  %1331 = vmatprep.mubr.msk.bf16.mxu0 %vm818_vm11, %v788_v11 }
 0x108   : > { %1332 = vmatmul.mubr.msk.bf16.gmra.mxu0 %vm818_vm11, %v790_v12 }
 0x16b   : > { %v1321_v59 = vpop.f32.mrf.mxu0 }
 0x16c   : > { %v882_v15 = vadd.f32 %v1321_v59, %v1868_v13 }
 0x16d   : > { %v873_v2 = vpop.f32.mrf.mxu0 }
 0x16e   : > { %v874_v14 = vadd.f32 %v1868_v13, %v873_v2  ;;  %v954_v23 = vmul.f32 0.01, %v882_v15  ;;  %vm938_vm15 = vcmp.gt.f32.partialorder %v882_v15, 0.0 }
 0x16f   : > { %v1322_v16 = vpop.f32.mrf.mxu0 }
 0x170   : > { %v885_v17 = vadd.f32 %v1322_v16, %v1868_v13  ;;  %v952_v19 = vmul.f32 0.01, %v874_v14  ;;  %vm936_vm14 = vcmp.gt.f32.partialorder %v874_v14, 0.0  ;;  %v970_v26 = vsel %vm938_vm15, %v882_v15, %v954_v23 }
 0x171   : > { %v876_v18 = vpop.f32.mrf.mxu0 }
 0x172   : > { %vm939_vm13 = vcmp.gt.f32.partialorder %v885_v17, 0.0  ;;  %v955_v20 = vmul.f32 0.01, %v885_v17  ;;  %v877_v21 = vadd.f32 %v1868_v13, %v876_v18  ;;  %v968_v25 = vsel %vm936_vm14, %v874_v14, %v952_v19 }
 0x174   : > { %v953_v3 = vmul.f32 0.01, %v877_v21  ;;  %vm937_vm0 = vcmp.gt.f32.partialorder %v877_v21, 0.0  ;;  %v971_v24 = vsel %vm939_vm13, %v885_v17, %v955_v20 }
 0x175   : > { %v985_v28 = vpack.c.bf16 %v971_v24, %v970_v26 }
 0x176   : > { %v969_v1 = vsel %vm937_vm0, %v877_v21, %v953_v3 }
 0x177   : > { %v984_v27 = vpack.c.bf16 %v969_v1, %v968_v25 }
 0x179   : > { %1337 = vmatprep.mubr.msk.bf16.mxu1 %vm672_vm4, %v984_v27 }
 0x17a   : > { %1338 = vmatmul.mubr.msk.bf16.vlgmr.msra.gmra.mxu1 %vm672_vm4, %v985_v28 }
 0x18b   : > { %v1325_v29 = vpop.f32.mrf.mxu0 }
 0x18c   : > { %v898_v32 = vadd.f32 %v1325_v29, %v1868_v13 }
 0x18d   : > { %v889_v31 = vpop.f32.mrf.mxu0 }
 0x18e   : > { %v890_v30 = vadd.f32 %v1868_v13, %v889_v31  ;;  %v958_v40 = vmul.f32 0.01, %v898_v32  ;;  %vm942_vm3 = vcmp.gt.f32.partialorder %v898_v32, 0.0 }
 0x18f   : > { %v1326_v33 = vpop.f32.mrf.mxu0 }
 0x190   : > { %v901_v34 = vadd.f32 %v1326_v33, %v1868_v13  ;;  %v956_v37 = vmul.f32 0.01, %v890_v30  ;;  %vm940_vm2 = vcmp.gt.f32.partialorder %v890_v30, 0.0  ;;  %v974_v42 = vsel %vm942_vm3, %v898_v32, %v958_v40 }
 0x191   : > { %v892_v36 = vpop.f32.mrf.mxu0 }
 0x192   : > { %vm943_vm1 = vcmp.gt.f32.partialorder %v901_v34, 0.0  ;;  %v959_v50 = vmul.f32 0.01, %v901_v34  ;;  %v893_v39 = vadd.f32 %v1868_v13, %v892_v36  ;;  %v972_v45 = vsel %vm940_vm2, %v890_v30, %v956_v37 }
 0x194   : > { %vm941_vm5 = vcmp.gt.f32.partialorder %v893_v39, 0.0  ;;  %v957_v41 = vmul.f32 0.01, %v893_v39  ;;  %v975_v44 = vsel %vm943_vm1, %v901_v34, %v959_v50 }
 0x195   : > { %v987_v47 = vpack.c.bf16 %v975_v44, %v974_v42 }
 0x196   : > { %v973_v46 = vsel %vm941_vm5, %v893_v39, %v957_v41 }
 0x197   : > { %v986_v43 = vpack.c.bf16 %v973_v46, %v972_v45 }
 0x199   : > { %1341 = vmatprep.mubr.msk.bf16.mxu1 %vm672_vm4, %v986_v43 }
 0x19a   : > { %1342 = vmatmul.mubr.msk.bf16.gmra.mxu1 %vm672_vm4, %v987_v47 }
 0x1ab   : > { %v1329_v48 = vpop.f32.mrf.mxu0 }
 0x1ac   : > { %v914_v53 = vadd.f32 %v1329_v48, %v1868_v13 }
 0x1ad   : > { %v905_v49 = vpop.f32.mrf.mxu0 }
 0x1ae   : > { %v906_v51 = vadd.f32 %v1868_v13, %v905_v49  ;;  %v962_v61 = vmul.f32 0.01, %v914_v53  ;;  %vm946_vm8 = vcmp.gt.f32.partialorder %v914_v53, 0.0 }
 0x1af   : > { %v1330_v54 = vpop.f32.mrf.mxu0 }
 0x1b0   : > { %v917_v55 = vadd.f32 %v1330_v54, %v1868_v13  ;;  %v960_v56 = vmul.f32 0.01, %v906_v51  ;;  %vm944_vm7 = vcmp.gt.f32.partialorder %v906_v51, 0.0  ;;  %v978_v5 = vsel %vm946_vm8, %v914_v53, %v962_v61 }
 0x1b1   : > { %v908_v35 = vpop.f32.mrf.mxu0 }
 0x1b2   : > { %vm947_vm6 = vcmp.gt.f32.partialorder %v917_v55, 0.0  ;;  %v963_v58 = vmul.f32 0.01, %v917_v55  ;;  %v909_v60 = vadd.f32 %v1868_v13, %v908_v35  ;;  %v976_v4 = vsel %vm944_vm7, %v906_v51, %v960_v56 }
 0x1b4   : > { %vm945_vm9 = vcmp.gt.f32.partialorder %v909_v60, 0.0  ;;  %v961_v62 = vmul.f32 0.01, %v909_v60  ;;  %v979_v63 = vsel %vm947_vm6, %v917_v55, %v963_v58 }
 0x1b5   : > { %v989_v7 = vpack.c.bf16 %v979_v63, %v978_v5 }
 0x1b6   : > { %v977_v0 = vsel %vm945_vm9, %v909_v60, %v961_v62 }
 0x1b7   : > { %v988_v6 = vpack.c.bf16 %v977_v0, %v976_v4 }
 0x1b9   : > { %1345 = vmatprep.mubr.msk.bf16.mxu1 %vm672_vm4, %v988_v6 }
 0x1ba   : > { %1346 = vmatmul.mubr.msk.bf16.gmra.mxu1 %vm672_vm4, %v989_v7 }
 0x1c8   : > { %v1333_v38 = vpop.f32.mrf.mxu0 }
 0x1c9   : > { %v930_v8 = vadd.f32 %v1333_v38, %v1868_v13 }
 0x1ca   : > { %v921_v52 = vpop.f32.mrf.mxu0 }
 0x1cb   : > { %v922_v57 = vadd.f32 %v1868_v13, %v921_v52  ;;  %v966_v2 = vmul.f32 0.01, %v930_v8  ;;  %vm950_vm12 = vcmp.gt.f32.partialorder %v930_v8, 0.0 }
 0x1cc   : > { %v1334_v22 = vpop.f32.mrf.mxu0 }
 0x1cd   : > { %v933_v9 = vadd.f32 %v1334_v22, %v1868_v13  ;;  %v964_v11 = vmul.f32 0.01, %v922_v57  ;;  %vm948_vm11 = vcmp.gt.f32.partialorder %v922_v57, 0.0  ;;  %v982_v18 = vsel %vm950_vm12, %v930_v8, %v966_v2 }
 0x1ce   : > { %v924_v10 = vpop.f32.mrf.mxu0 }
 0x1cf   : > { %vm951_vm10 = vcmp.gt.f32.partialorder %v933_v9, 0.0  ;;  %v967_v12 = vmul.f32 0.01, %v933_v9  ;;  %v925_v59 = vadd.f32 %v1868_v13, %v924_v10  ;;  %v980_v16 = vsel %vm948_vm11, %v922_v57, %v964_v11  ;;  %v1282_v13 = vld [vmem:[%s1939_s4] ss:$0 sm:$0xff] }
 0x1d1   : > { %vm949_vm13 = vcmp.gt.f32.partialorder %v925_v59, 0.0  ;;  %v965_v14 = vmul.f32 0.01, %v925_v59  ;;  %v983_v15 = vsel %vm951_vm10, %v933_v9, %v967_v12 }
 0x1d2   : > { %v991_v20 = vpack.c.bf16 %v983_v15, %v982_v18 }
 0x1d3   : > { %v981_v17 = vsel %vm949_vm13, %v925_v59, %v965_v14 }
 0x1d4   : > { %v990_v19 = vpack.c.bf16 %v981_v17, %v980_v16 }
 0x1d6   : > { %1349 = vmatprep.mubr.msk.bf16.mxu1 %vm672_vm4, %v990_v19 }
 0x1d7   : > { %1350 = vmatmul.mubr.msk.bf16.gmra.mxu1 %vm672_vm4, %v991_v20 }
 0x23a   : > { %v1339_v21 = vpop.f32.mrf.mxu1 }
 0x23b   : > { %v1071_v23 = vadd.f32 %v1339_v21, %v1282_v13 }
 0x23c   : > { %v1062_v3 = vpop.f32.mrf.mxu1 }
 0x23d   : > { %1127 = vst [vmem:[%s1902_s17 + $0x10] sm:$0xff] %v1071_v23  ;;  %v1063_v24 = vadd.f32 %v1282_v13, %v1062_v3 }
 0x23e   : > { %v1340_v25 = vpop.f32.mrf.mxu1 }
 0x23f   : > { %1125 = vst [vmem:[%s1902_s17] sm:$0xff] %v1063_v24  ;;  %v1074_v1 = vadd.f32 %v1340_v25, %v1282_v13 }
 0x240   : > { %v1065_v26 = vpop.f32.mrf.mxu1 }
 0x241   : > { %1128 = vst [vmem:[%s1902_s17 + $0x18] sm:$0xff] %v1074_v1  ;;  %v1066_v27 = vadd.f32 %v1282_v13, %v1065_v26 }
 0x243   : > { %1126 = vst [vmem:[%s1902_s17 + $0x8] sm:$0xff] %v1066_v27 }
 0x25a   : > { %v1343_v28 = vpop.f32.mrf.mxu1 }
 0x25b   : > { %v1087_v29 = vadd.f32 %v1343_v28, %v1282_v13 }
 0x25c   : > { %v1078_v31 = vpop.f32.mrf.mxu1 }
 0x25d   : > { %1131 = vst [vmem:[%s1902_s17 + $0x30] sm:$0xff] %v1087_v29  ;;  %v1079_v30 = vadd.f32 %v1282_v13, %v1078_v31 }
 0x25e   : > { %v1344_v32 = vpop.f32.mrf.mxu1 }
 0x25f   : > { %1129 = vst [vmem:[%s1902_s17 + $0x20] sm:$0xff] %v1079_v30  ;;  %v1090_v33 = vadd.f32 %v1344_v32, %v1282_v13 }
 0x260   : > { %v1081_v34 = vpop.f32.mrf.mxu1 }
 0x261   : > { %1132 = vst [vmem:[%s1902_s17 + $0x38] sm:$0xff] %v1090_v33  ;;  %v1082_v36 = vadd.f32 %v1282_v13, %v1081_v34 }
 0x263   : > { %1130 = vst [vmem:[%s1902_s17 + $0x28] sm:$0xff] %v1082_v36 }
 0x27a   : > { %v1347_v37 = vpop.f32.mrf.mxu1 }
 0x27b   : > { %v1103_v50 = vadd.f32 %v1347_v37, %v1282_v13 }
 0x27c   : > { %v1094_v39 = vpop.f32.mrf.mxu1 }
 0x27d   : > { %1135 = vst [vmem:[%s1902_s17 + $0x50] sm:$0xff] %v1103_v50  ;;  %v1095_v40 = vadd.f32 %v1282_v13, %v1094_v39 }
 0x27e   : > { %v1348_v41 = vpop.f32.mrf.mxu1 }
 0x27f   : > { %1133 = vst [vmem:[%s1902_s17 + $0x40] sm:$0xff] %v1095_v40  ;;  %v1106_v44 = vadd.f32 %v1348_v41, %v1282_v13 }
 0x280   : > { %v1097_v45 = vpop.f32.mrf.mxu1 }
 0x281   : > { %1136 = vst [vmem:[%s1902_s17 + $0x58] sm:$0xff] %v1106_v44  ;;  %v1098_v46 = vadd.f32 %v1282_v13, %v1097_v45 }
 0x283   : > { %1134 = vst [vmem:[%s1902_s17 + $0x48] sm:$0xff] %v1098_v46 }
 0x297   : > { %v1351_v42 = vpop.f32.mrf.mxu1 }
 0x298   : > { %v1119_v43 = vadd.f32 %v1351_v42, %v1282_v13 }
 0x299   : > { %v1110_v47 = vpop.f32.mrf.mxu1 }
 0x29a   : > { %1139 = vst [vmem:[%s1902_s17 + $0x70] sm:$0xff] %v1119_v43  ;;  %v1111_v48 = vadd.f32 %v1282_v13, %v1110_v47 }
 0x29b   : > { %v1352_v49 = vpop.f32.mrf.mxu1 }
 0x29c   : > { %1137 = vst [vmem:[%s1902_s17 + $0x60] sm:$0xff] %v1111_v48  ;;  %v1122_v51 = vadd.f32 %v1352_v49, %v1282_v13 }
 0x29d   : > { %v1113_v53 = vpop.f32.mrf.mxu1 }
 0x29e   : > { %1140 = vst [vmem:[%s1902_s17 + $0x78] sm:$0xff] %v1122_v51  ;;  %v1114_v54 = vadd.f32 %v1282_v13, %v1113_v53 }
 0x2a0   : > { %1138 = vst [vmem:[%s1902_s17 + $0x68] sm:$0xff] %v1114_v54 }
 0x2a1 PF: > { %s15_s22 = sadd.s32 1, %s1466_s22   ;;  %s1941_s18 = smov %s1458_s20 }
 0x2a2   : > { %p12_p8 = scmp.ge.s32.totalorder %s15_s22, 6   ;;  %s1942_s19 = smov %s1462_s21 }
 0x2a3   : > { %s1943_s20 = smov %s1946_s23  ;;  %s1944_s21 = smov %s1950_s24 }
 0x2a4   :  { %14 = sbr.rel (!%p12_p8) target bundleno = 3 (0x3), region = 70 }

</bundles_post_ra>
